<compile_context>
chip_gen: v5e
topology: v5e:2x2
jax: 0.10.0
libtpu: 0.0.40
codegen_flags: <defaults>
</compile_context>

<pallas_src>
import jax
import jax.numpy as jnp
from jax.experimental import pallas as pl
from jax.experimental.pallas import tpu as pltpu

LANE = 128
IN_FEATURES = 18
HIDDEN = 128
OUT_FEATURES = 9


def dqn_kernel(x_ref, w1_ref, b1_ref, w2_ref, b2_ref, w3_ref, b3_ref, o_ref):
    # fc1 + relu. x arrives as (TB, 18) f32; cast to bf16 for the MXU.
    x = x_ref[...].astype(jnp.bfloat16)
    h1 = jnp.dot(x, w1_ref[...], preferred_element_type=jnp.float32)
    h1 = jnp.maximum(h1 + b1_ref[...], 0.0)
    # fc2 + relu
    h2 = jnp.dot(h1.astype(jnp.bfloat16), w2_ref[...],
                 preferred_element_type=jnp.float32)
    h2 = jnp.maximum(h2 + b2_ref[...], 0.0)
    # head: MXU-aligned (128x128) matmul against zero-padded w3, then slice the
    # 9 real Q-value lanes and store a narrow (TB, 9) block (tiny HBM write).
    q = jnp.dot(h2.astype(jnp.bfloat16), w3_ref[...],
                preferred_element_type=jnp.float32)
    o_ref[...] = (q[:, :OUT_FEATURES] + b3_ref[...]).astype(o_ref.dtype)


def _round_up(x, m):
    return ((x + m - 1) // m) * m


def prepare_params(params):
    """Transpose-layout params -> kernel layout: bf16 weights (resident), f32 biases."""
    w1, b1, w2, b2, w3, b3 = params
    w1p = w1.astype(jnp.bfloat16)                                                # (18, 128)
    b1p = b1.astype(jnp.float32)                                                 # (1, 128)
    w2p = w2.astype(jnp.bfloat16)                                                # (128, 128)
    b2p = b2.astype(jnp.float32)                                                 # (1, 128)
    w3p = jnp.pad(w3, ((0, 0), (0, LANE - OUT_FEATURES))).astype(jnp.bfloat16)   # (128, 128)
    b3p = b3.astype(jnp.float32)                                                 # (1, 9)
    return w1p, b1p, w2p, b2p, w3p, b3p


def dqn_forward(x, prepared_params, *, tb=2048):
    """x: any shape (B, ...) that flattens to (B, 18), like torch .view(B, -1)."""
    B = x.shape[0]
    x2d = x.reshape(B, -1).astype(jnp.float32)
    assert x2d.shape[1] == IN_FEATURES, f"expected {IN_FEATURES} features, got {x2d.shape[1]}"
    w1p, b1p, w2p, b2p, w3p, b3p = prepared_params

    # Pad batch only to the next sublane multiple (<= 7 rows), never to a full tile.
    B_pad = _round_up(B, 8)
    if B_pad != B:
        x2d = jnp.pad(x2d, ((0, B_pad - B), (0, 0)))

    # Batch tile: single block for small batches; otherwise >= 2 grid steps so v7x's
    # two TensorCores both get work. tb=2048 keeps VMEM use tiny even on v5e.
    if B_pad <= 512:
        TB = B_pad
    else:
        TB = min(tb, _round_up(-(-B_pad // 2), 8))
    n_blocks = -(-B_pad // TB)          # ragged last block is fine (masked by Pallas)

    resident = lambda i: (0, 0)         # weights/biases pinned in VMEM across steps
    batch_tile = lambda i: (i, 0)

    out = pl.pallas_call(
        dqn_kernel,
        out_shape=jax.ShapeDtypeStruct((B_pad, OUT_FEATURES), jnp.float32),
        grid_spec=pltpu.PrefetchScalarGridSpec(
            num_scalar_prefetch=0,
            grid=(n_blocks,),
            in_specs=[
                pl.BlockSpec((TB, IN_FEATURES), batch_tile),      # x: narrow 18-wide read
                pl.BlockSpec((IN_FEATURES, HIDDEN), resident),    # w1 (18, 128)
                pl.BlockSpec((1, HIDDEN), resident),              # b1
                pl.BlockSpec((HIDDEN, HIDDEN), resident),         # w2
                pl.BlockSpec((1, HIDDEN), resident),              # b2
                pl.BlockSpec((HIDDEN, LANE), resident),           # w3 padded (128, 128)
                pl.BlockSpec((1, OUT_FEATURES), resident),        # b3 (1, 9)
            ],
            out_specs=pl.BlockSpec((TB, OUT_FEATURES), batch_tile),  # narrow 9-wide write
        ),
        compiler_params=pltpu.CompilerParams(
            dimension_semantics=("parallel",),                    # megacore / v7x dual-TC
        ),
    )(x2d, w1p, b1p, w2p, b2p, w3p, b3p)

    return out[:B] if B_pad != B else out


def init_params(key):
    """Deterministic init mirroring nn.Linear default (U(-1/sqrt(fan_in), 1/sqrt(fan_in)))."""
    dims = [(IN_FEATURES, HIDDEN), (HIDDEN, HIDDEN), (HIDDEN, OUT_FEATURES)]
    params = []
    for fan_in, fan_out in dims:
        kw, kb, key = jax.random.split(key, 3)
        bound = 1.0 / (fan_in ** 0.5)
        w = jax.random.uniform(kw, (fan_in, fan_out), jnp.float32, -bound, bound)
        b = jax.random.uniform(kb, (1, fan_out), jnp.float32, -bound, bound)
        params += [w, b]
    return params


if __name__ == "__main__":
    key = jax.random.PRNGKey(0)
    kx, kp = jax.random.split(key)
    # Board-like input (B, 3, 3, 2) that flattens to (B, 18), as the torch forward implies.
    x = jax.random.normal(kx, (2, 3, 3, 2), dtype=jnp.float32)
    raw_params = init_params(kp)
    prepared = prepare_params(raw_params)

    out = dqn_forward(x, prepared)
    jax.block_until_ready(out)
    assert out.shape == (2, OUT_FEATURES)

    # Reference 1: matched-precision JAX (bf16 operands, f32 accumulation) -> tight check.
    w1p, b1p, w2p, b2p, w3p, b3p = prepared
    x2d = x.reshape(2, -1).astype(jnp.float32)
    xb = x2d.astype(jnp.bfloat16)
    h1 = jnp.maximum(jnp.dot(xb, w1p, preferred_element_type=jnp.float32) + b1p, 0.0)
    h2 = jnp.maximum(jnp.dot(h1.astype(jnp.bfloat16), w2p,
                             preferred_element_type=jnp.float32) + b2p, 0.0)
    ref_bf16 = (jnp.dot(h2.astype(jnp.bfloat16), w3p,
                        preferred_element_type=jnp.float32)[:, :OUT_FEATURES] + b3p)
    assert jnp.allclose(out, ref_bf16, atol=1e-4, rtol=1e-4)

    # Reference 2: full-f32 math (the exact torch semantics) -> loose check (bf16 weights).
    w1, b1, w2, b2, w3, b3 = raw_params
    ref_f32 = jnp.maximum(x2d @ w1 + b1, 0.0)
    ref_f32 = jnp.maximum(ref_f32 @ w2 + b2, 0.0)
    ref_f32 = ref_f32 @ w3 + b3
    assert jnp.allclose(out, ref_f32, atol=5e-2, rtol=5e-2)

    print("KERNEL_OK")
</pallas_src>

<mosaic_0001>
module attributes {stable_mosaic.version = 11 : i64} {
  func.func @dqn_kernel(%arg0: i32, %arg1: memref<8x18xf32, #tpu.memory_space<vmem>>, %arg2: memref<18x128xbf16, #tpu.memory_space<vmem>>, %arg3: memref<1x128xf32, #tpu.memory_space<vmem>>, %arg4: memref<128x128xbf16, #tpu.memory_space<vmem>>, %arg5: memref<1x128xf32, #tpu.memory_space<vmem>>, %arg6: memref<128x128xbf16, #tpu.memory_space<vmem>>, %arg7: memref<1x9xf32, #tpu.memory_space<vmem>>, %arg8: memref<8x9xf32, #tpu.memory_space<vmem>>) attributes {dimension_semantics = [#tpu.dimension_semantics<parallel>], iteration_bounds = array<i64: 1>, scalar_prefetch = 0 : i64, scratch_operands = 0 : i64, tpu.core_type = #tpu.core_type<tc>, window_params = [{transform_indices = @transform_0, window_bounds = array<i64: 8, 18>}, {pipeline_mode = #tpu.pipeline_mode<synchronous>, transform_indices = @transform_1, window_bounds = array<i64: 18, 128>}, {pipeline_mode = #tpu.pipeline_mode<synchronous>, transform_indices = @transform_2, window_bounds = array<i64: 1, 128>}, {pipeline_mode = #tpu.pipeline_mode<synchronous>, transform_indices = @transform_3, window_bounds = array<i64: 128, 128>}, {pipeline_mode = #tpu.pipeline_mode<synchronous>, transform_indices = @transform_4, window_bounds = array<i64: 1, 128>}, {pipeline_mode = #tpu.pipeline_mode<synchronous>, transform_indices = @transform_5, window_bounds = array<i64: 128, 128>}, {pipeline_mode = #tpu.pipeline_mode<synchronous>, transform_indices = @transform_6, window_bounds = array<i64: 1, 9>}, {transform_indices = @transform_7, window_bounds = array<i64: 8, 9>}]} {
    %c0 = arith.constant 0 : index
    %c0_0 = arith.constant 0 : index
    %0 = vector.load %arg1[%c0, %c0_0] : memref<8x18xf32, #tpu.memory_space<vmem>>, vector<8x18xf32>
    %1 = arith.truncf %0 : vector<8x18xf32> to vector<8x18xbf16>
    %c0_1 = arith.constant 0 : index
    %c0_2 = arith.constant 0 : index
    %2 = vector.load %arg2[%c0_1, %c0_2] : memref<18x128xbf16, #tpu.memory_space<vmem>>, vector<18x128xbf16>
    %cst = arith.constant dense<0.000000e+00> : vector<8x128xf32>
    %3 = tpu.matmul %1, %2, %cst {dimension_numbers = #tpu.dot_dimension_numbers<[1], [0], [0], [1], [0, 0, 1, 1], [], []>} : vector<8x18xbf16>, vector<18x128xbf16>, vector<8x128xf32> -> vector<8x128xf32>
    %c0_3 = arith.constant 0 : index
    %c0_4 = arith.constant 0 : index
    %4 = vector.load %arg3[%c0_3, %c0_4] : memref<1x128xf32, #tpu.memory_space<vmem>>, vector<1x128xf32>
    %5 = vector.broadcast %4 : vector<1x128xf32> to vector<8x128xf32>
    %6 = arith.addf %3, %5 : vector<8x128xf32>
    %cst_5 = arith.constant 0.000000e+00 : f32
    %7 = vector.broadcast %cst_5 : f32 to vector<8x128xf32>
    %8 = arith.maximumf %6, %7 : vector<8x128xf32>
    %9 = arith.truncf %8 : vector<8x128xf32> to vector<8x128xbf16>
    %c0_6 = arith.constant 0 : index
    %c0_7 = arith.constant 0 : index
    %10 = vector.load %arg4[%c0_6, %c0_7] : memref<128x128xbf16, #tpu.memory_space<vmem>>, vector<128x128xbf16>
    %cst_8 = arith.constant dense<0.000000e+00> : vector<8x128xf32>
    %11 = tpu.matmul %9, %10, %cst_8 {dimension_numbers = #tpu.dot_dimension_numbers<[1], [0], [0], [1], [0, 0, 1, 1], [], []>} : vector<8x128xbf16>, vector<128x128xbf16>, vector<8x128xf32> -> vector<8x128xf32>
    %c0_9 = arith.constant 0 : index
    %c0_10 = arith.constant 0 : index
    %12 = vector.load %arg5[%c0_9, %c0_10] : memref<1x128xf32, #tpu.memory_space<vmem>>, vector<1x128xf32>
    %13 = vector.broadcast %12 : vector<1x128xf32> to vector<8x128xf32>
    %14 = arith.addf %11, %13 : vector<8x128xf32>
    %cst_11 = arith.constant 0.000000e+00 : f32
    %15 = vector.broadcast %cst_11 : f32 to vector<8x128xf32>
    %16 = arith.maximumf %14, %15 : vector<8x128xf32>
    %17 = arith.truncf %16 : vector<8x128xf32> to vector<8x128xbf16>
    %c0_12 = arith.constant 0 : index
    %c0_13 = arith.constant 0 : index
    %18 = vector.load %arg6[%c0_12, %c0_13] : memref<128x128xbf16, #tpu.memory_space<vmem>>, vector<128x128xbf16>
    %cst_14 = arith.constant dense<0.000000e+00> : vector<8x128xf32>
    %19 = tpu.matmul %17, %18, %cst_14 {dimension_numbers = #tpu.dot_dimension_numbers<[1], [0], [0], [1], [0, 0, 1, 1], [], []>} : vector<8x128xbf16>, vector<128x128xbf16>, vector<8x128xf32> -> vector<8x128xf32>
    %20 = vector.extract_strided_slice %19 {offsets = [0, 0], sizes = [8, 9], strides = [1, 1]} : vector<8x128xf32> to vector<8x9xf32>
    %c0_15 = arith.constant 0 : index
    %c0_16 = arith.constant 0 : index
    %21 = vector.load %arg7[%c0_15, %c0_16] : memref<1x9xf32, #tpu.memory_space<vmem>>, vector<1x9xf32>
    %22 = vector.broadcast %21 : vector<1x9xf32> to vector<8x9xf32>
    %23 = arith.addf %20, %22 : vector<8x9xf32>
    %c0_17 = arith.constant 0 : index
    %c0_18 = arith.constant 0 : index
    %24 = vector.load %arg8[%c0_17, %c0_18] : memref<8x9xf32, #tpu.memory_space<vmem>>, vector<8x9xf32>
    tpu.vector_store %arg8[%c0_17, %c0_18], %23 {strides = array<i32>} : memref<8x9xf32, #tpu.memory_space<vmem>>, vector<8x9xf32>,
    return
  }
  func.func @transform_0(%arg0: i32) -> (i32, i32) {
    %c0_i32 = arith.constant 0 : i32
    %c0_i32_0 = arith.constant 0 : i32
    return %arg0, %c0_i32 : i32, i32
  }
  func.func @transform_1(%arg0: i32) -> (i32, i32) {
    %c0_i32 = arith.constant 0 : i32
    %c0_i32_0 = arith.constant 0 : i32
    %c0_i32_1 = arith.constant 0 : i32
    return %c0_i32, %c0_i32_0 : i32, i32
  }
  func.func @transform_2(%arg0: i32) -> (i32, i32) {
    %c0_i32 = arith.constant 0 : i32
    %c0_i32_0 = arith.constant 0 : i32
    %c0_i32_1 = arith.constant 0 : i32
    return %c0_i32, %c0_i32_0 : i32, i32
  }
  func.func @transform_3(%arg0: i32) -> (i32, i32) {
    %c0_i32 = arith.constant 0 : i32
    %c0_i32_0 = arith.constant 0 : i32
    %c0_i32_1 = arith.constant 0 : i32
    return %c0_i32, %c0_i32_0 : i32, i32
  }
  func.func @transform_4(%arg0: i32) -> (i32, i32) {
    %c0_i32 = arith.constant 0 : i32
    %c0_i32_0 = arith.constant 0 : i32
    %c0_i32_1 = arith.constant 0 : i32
    return %c0_i32, %c0_i32_0 : i32, i32
  }
  func.func @transform_5(%arg0: i32) -> (i32, i32) {
    %c0_i32 = arith.constant 0 : i32
    %c0_i32_0 = arith.constant 0 : i32
    %c0_i32_1 = arith.constant 0 : i32
    return %c0_i32, %c0_i32_0 : i32, i32
  }
  func.func @transform_6(%arg0: i32) -> (i32, i32) {
    %c0_i32 = arith.constant 0 : i32
    %c0_i32_0 = arith.constant 0 : i32
    %c0_i32_1 = arith.constant 0 : i32
    return %c0_i32, %c0_i32_0 : i32, i32
  }
  func.func @transform_7(%arg0: i32) -> (i32, i32) {
    %c0_i32 = arith.constant 0 : i32
    %c0_i32_0 = arith.constant 0 : i32
    return %arg0, %c0_i32 : i32, i32
  }
}

</mosaic_0001>

<bundles_post_ra>
// kernel: tpu_custom_call.1
= control target key start
LH: loop header
LB: loop body
LE: loop exit
PB: predicated region body
PF: predicated region fallthrough
CT: control target
= control target key end

     0   :  { %12 = vsyncpa [#allocation3], 0  ;;  %s611_s0 = inlined_call_operand.hbm [shape: f32[8,18], index: 0, kind: input, shape index: {}]   ;;  %s612_s1 = inlined_call_operand.hbm [shape: bf16[18,128], index: 1, kind: input, shape index: {}]   ;;  %s613_s2 = inlined_call_operand.vmem [shape: f32[1,128], index: 2, kind: input, shape index: {}]   ;;  %s614_s3 = inlined_call_operand.hbm [shape: bf16[128,128], index: 3, kind: input, shape index: {}]   ;;  %s615_s4 = inlined_call_operand.vmem [shape: f32[1,128], index: 4, kind: input, shape index: {}]   ;;  %s616_s5 = inlined_call_operand.hbm [shape: bf16[128,128], index: 5, kind: input, shape index: {}]   ;;  %s617_s6 = inlined_call_operand.vmem [shape: f32[1,9], index: 6, kind: input, shape index: {}]   ;;  %s618_s7 = inlined_call_operand.hbm [shape: f32[8,9], index: 7, kind: output, shape index: {}]  }
   0x1   :  { %13 = vsyncpa [#allocation6], 0 }
   0x2   :  { %14 = vsyncpa [#allocation9], 0  ;;  %s31_s26 = sshll.u32 %s612_s1, 4  ;;  %s32_s26 = int_to_ptr.hbm [resolvable:$true] %s31_s26 }
   0x3   :  { %15 = vsyncpa [#allocation4], 0  ;;  %s540_s27 = smov [#allocation5]   ;;  %s21_s8 = sshll.u32 %s611_s0, 4  ;;  %s22_s8 = int_to_ptr.hbm [resolvable:$true] %s21_s8 }
   0x4   :  { %s33_s28 = sshll.u32 %s540_s27, 4  ;;  %s541_s9 = smov 64   ;;  %s34_s28 = int_to_ptr.vmem [resolvable:$true] %s33_s28 }
   0x5   :  { %s542_s10 = smov 4   ;;  %s543_s11 = smov [#allocation2]  }
   0x6   :  { %39 = dma.hbm_to_vmem [thread:$0]  %s32_s26, 192, %s34_s28, [#allocation6], %s541_s9, %s541_s9, %s542_s10  }
   0x7   :  { %s23_s12 = sshll.u32 %s543_s11, 4  ;;  %s46_s15 = sshll.u32 %s614_s3, 4  ;;  %s24_s12 = int_to_ptr.vmem [resolvable:$true] %s23_s12  ;;  %s47_s15 = int_to_ptr.hbm [resolvable:$true] %s46_s15 }
   0x8   :  { %26 = dma.hbm_to_vmem [thread:$0]  %s22_s8, 128, %s24_s12, [#allocation3]  }
   0x9   :  { %s61_s17 = sshll.u32 %s616_s5, 4  ;;  %s544_s18 = smov [#allocation7]   ;;  %s62_s17 = int_to_ptr.hbm [resolvable:$true] %s61_s17 }
   0xa   :  { %s48_s19 = sshll.u32 %s544_s18, 4  ;;  %s545_s0 = smov [#allocation8]   ;;  %s49_s19 = int_to_ptr.vmem [resolvable:$true] %s48_s19 }
   0xb   :  { %54 = dma.hbm_to_vmem [thread:$0]  %s47_s15, 1024, %s49_s19, [#allocation6], %s541_s9, %s541_s9, %s542_s10  }
   0xc   :  { %s63_s20 = sshll.u32 %s545_s0, 4  ;;  %s64_s20 = int_to_ptr.vmem [resolvable:$true] %s63_s20 }
   0xd   :  { %69 = dma.hbm_to_vmem [thread:$0]  %s62_s17, 1024, %s64_s20, [#allocation9], %s541_s9, %s541_s9, %s542_s10  }
   0xe   :  { %532 = dma.done.wait [#allocation3], 128  }
   0xf   :  { %533 = vsyncadd [#allocation3], 4294967168 }
  0x10   :  { %534 = dma.done.wait [#allocation6], 1216  }
  0x11   :  { %535 = vsyncadd [#allocation6], 4294966080 }
  0x12   :  { %536 = dma.done.wait [#allocation9], 1024  }
  0x13   :  { %537 = vsyncadd [#allocation9], 4294966272  ;;  %v93_v0 = vld [vmem:[#allocation5 + $0x8] sm:$0x1]  ;;  %vm111_vm0 = vcmask 1040384   ;;  %v392_v4 = vld [vmem:[#allocation7 + $0x30] sm:$0xff] }
  0x14   :  { %v103_v1 = vunpack.c.l.b16 %v93_v0  ;;  %v393_v2 = vld [vmem:[#allocation7 + $0x38] sm:$0xff]  ;;  %v89_v7 = vld [vmem:[#allocation2] sm:$0xff]  ;;  %vm107_vm1 = vcmask 146432   ;;  %v390_v10 = vld [vmem:[#allocation7 + $0x20] sm:$0xff]  ;;  %s546_s24 = smov [#allocation10]   ;;  %s304_s28 = sshll.u32 %s618_s7, 4  ;;  %s305_s28 = int_to_ptr.hbm [resolvable:$true] %s304_s28 }
  0x15   :  { %198 = vmatpush.bf16.msra.mxu1 %v393_v2  ;;  %v385_v6 = vld [vmem:[#allocation5] sm:$0xff]  ;;  %v391_v8 = vld [vmem:[#allocation7 + $0x28] sm:$0xff]  ;;  %v90_v9 = vpack.c.bf16 %v89_v7, %v89_v7  ;;  %v386_v14 = vld [vmem:[#allocation7] sm:$0xff]  ;;  %s302_s25 = sshll.u32 %s546_s24, 4  ;;  %vm295_vm2 = vcmask 72704   ;;  %s303_s25 = int_to_ptr.vmem [resolvable:$true] %s302_s25 }
  0x16   :  { %v105_v3 = vpack.c.b16 %v103_v1, %v103_v1  ;;  %v389_v11 = vld [vmem:[#allocation7 + $0x18] sm:$0xff]  ;;  %v388_v12 = vld [vmem:[#allocation7 + $0x10] sm:$0xff]  ;;  %v387_v13 = vld [vmem:[#allocation7 + $0x8] sm:$0xff] }
  0x17   :  { %v401_v15 = vld [vmem:[#allocation8 + $0x38] sm:$0xff]  ;;  %v400_v16 = vld [vmem:[#allocation8 + $0x30] sm:$0xff]  ;;  %v399_v17 = vld [vmem:[#allocation8 + $0x28] sm:$0xff] }
  0x18   :  { %v113_v5 = vsel %vm111_vm0, %v105_v3, 0  ;;  %277 = vmatpush.bf16.msra.mxu2 %v401_v15  ;;  %v398_v18 = vld [vmem:[#allocation8 + $0x20] sm:$0xff]  ;;  %v397_v19 = vld [vmem:[#allocation8 + $0x18] sm:$0xff]  ;;  %v396_v20 = vld [vmem:[#allocation8 + $0x10] sm:$0xff] }
  0x19   :  { %121 = vmatpush.bf16.msra.mxu0 %v113_v5  ;;  %199 = vmatpush.bf16.msra.mxu1 %v392_v4  ;;  %v409_v21 = vld [vmem:[%s613_s2] ss:$0 sm:$0xff]  ;;  %v394_v28 = vld [vmem:[#allocation8] sm:$0xff] }
  0x1a   :  { %v395_v27 = vld [vmem:[#allocation8 + $0x8] sm:$0xff] }
  0x1b   :  { %v410_v29 = vld [vmem:[%s615_s4] ss:$0 sm:$0xff] }
  0x1c   :  { %278 = vmatpush.bf16.msra.mxu2 %v400_v16  ;;  %v411_v35 = vld [vmem:[%s617_s6] ss:$0 sm:$0xff] }
  0x1d   :  { %122 = vmatpush.bf16.msra.mxu0 %v385_v6  ;;  %200 = vmatpush.bf16.msra.mxu1 %v391_v8 }
  0x20   :  { %320 = vmatmul.msk.bf16.vlgmr.msra.gmra.mxu0 %vm107_vm1, %v90_v9  ;;  %279 = vmatpush.bf16.msra.mxu2 %v399_v17 }
  0x21   :  { %201 = vmatpush.bf16.msra.mxu1 %v390_v10 }
  0x24   :  { %280 = vmatpush.bf16.msra.mxu2 %v398_v18 }
  0x25   :  { %202 = vmatpush.bf16.msra.mxu1 %v389_v11 }
  0x28   :  { %281 = vmatpush.bf16.msra.mxu2 %v397_v19 }
  0x29   :  { %203 = vmatpush.bf16.msra.mxu1 %v388_v12 }
  0x2c   :  { %282 = vmatpush.bf16.msra.mxu2 %v396_v20 }
  0x2d   :  { %204 = vmatpush.bf16.msra.mxu1 %v387_v13 }
  0x30   :  { %283 = vmatpush.bf16.msra.mxu2 %v395_v27 }
  0x31   :  { %205 = vmatpush.bf16.msra.mxu1 %v386_v14 }
  0x34   :  { %284 = vmatpush.bf16.msra.mxu2 %v394_v28 }
  0x9d   :  { %v124_v22 = vpop.f32.mrf.mxu0 }
  0x9e   :  { %v125_v23 = vadd.f32 %v409_v21, %v124_v22 }
  0xa0   :  { %v128_v24 = vmax.f32 %v125_v23, 0.0 }
  0xa2   :  { %v129_v25 = vpack.c.bf16 %v128_v24, %v128_v24 }
  0xa4   :  { %206 = vmatmul.bf16.vlgmr.msra.gmra.mxu1 %v129_v25 }
  0xa5   :  { %v126_v26 = vpop.f32.mrf.mxu0 }
 0x121   :  { %v207_v30 = vpop.f32.mrf.mxu1 }
 0x122   :  { %v208_v31 = vadd.f32 %v410_v29, %v207_v30 }
 0x124   :  { %v211_v32 = vmax.f32 %v208_v31, 0.0 }
 0x126   :  { %v212_v33 = vpack.c.bf16 %v211_v32, %v211_v32 }
 0x128   :  { %285 = vmatmul.bf16.vlgmr.msra.gmra.mxu2 %v212_v33 }
 0x129   :  { %v209_v34 = vpop.f32.mrf.mxu1 }
 0x1ab   :  { %v286_v36 = vpop.f32.mrf.mxu2 }
 0x1ac   :  { %v294_v37 = vadd.f32 %v411_v35, %v286_v36 }
 0x1ae   :  { %296 = vst.msk [vmem:[#allocation10] sm:$0xff] %vm295_vm2, %v294_v37 }
 0x1af   :  { %307 = dma.vmem_to_hbm [thread:$0]  %s303_s25, 128, %s305_s28, [#allocation4]  }
 0x1b3   :  { %v288_v38 = vpop.f32.mrf.mxu2 }
 0x1b4   :  { %538 = dma.done.wait [#allocation4], 128  }
 0x1b5   :  { %539 = vsyncadd [#allocation4], 4294967168 }
 0x1b6   :  { %312 = vsyncpa [#allocation3], 1 }
 0x1b7   :  { %313 = vsyncpa [#allocation6], 1 }
 0x1b8   :  { %314 = vsyncpa [#allocation9], 1 }
 0x1b9   :  { %315 = vsyncpa [#allocation4], 1 }

</bundles_post_ra>
